<compile_context>
chip_gen: v7x
topology: tpu7x:2x2x1
jax: 0.10.0
libtpu: 0.0.40
codegen_flags: <defaults>
</compile_context>

<pallas_src>
import jax
import jax.numpy as jnp
from jax.experimental import pallas as pl
from jax.experimental.pallas import tpu as pltpu


def _distlinear_kernel(x_ref, w_ref, invx_ref, invw_ref, o_ref):
    k = pl.program_id(2)

    # Pure MXU work: contract the last dims of x (tb, td) and W (to, td);
    # no transpose, f32 accumulation.
    partial = jax.lax.dot_general(
        x_ref[...], w_ref[...],
        dimension_numbers=(((1,), (1,)), ((), ())),
        preferred_element_type=jnp.float32)

    @pl.when(k == 0)
    def _init():
        o_ref[...] = partial

    @pl.when(k != 0)
    def _accum():
        o_ref[...] += partial

    @pl.when(k == pl.num_programs(2) - 1)
    def _finalize():
        # Outer product of reciprocal norms; the 10.0 scale is folded into inv_x.
        o_ref[...] *= invx_ref[...] * invw_ref[...]


def _round_up(v, m):
    return (v + m - 1) // m * m


def _cdiv(a, b):
    return -(-a // b)


def _balanced_tile(dim, max_tile, align, min_blocks=1):
    """Tile size that balances blocks (minimal padding) under a max tile size."""
    n = max(_cdiv(dim, max_tile), min_blocks)
    t = _round_up(_cdiv(dim, n), align)
    return t, t * n


def _pick_vmem_limit():
    # Generation-aware VMEM budget: ~75% of physical, never above 96 MiB.
    # Fallback assumes v7x's 64 MiB per-TC VMEM (most restrictive).
    try:
        cap = int(pltpu.get_tpu_info().vmem_capacity_bytes)
    except Exception:
        cap = 64 * 1024 * 1024
    return max(32 * 1024 * 1024, min(cap * 3 // 4, 96 * 1024 * 1024))


def dist_linear(x, weight, *, tb=None, to=None, td=None,
                compute_dtype=jnp.bfloat16):
    """x: (B, indim), weight: (outdim, indim) -> scores: (B, outdim) float32."""
    B, D = x.shape
    O, D2 = weight.shape
    assert D == D2, "feature dims must match"

    # bf16 packs 2 rows per sublane -> align batch tiles to 16 when using bf16.
    sub_align = 16 if compute_dtype == jnp.bfloat16 else 8

    auto_tb, auto_to = tb is None, to is None
    if auto_tb:
        tb, Bp = _balanced_tile(B, 512, sub_align)
    else:
        Bp = _round_up(B, tb)
    if auto_to:
        to, Op = _balanced_tile(O, 512, 128)
    else:
        Op = _round_up(O, to)
    if td is None:
        td, Dp = _balanced_tile(D, 1024, 128)
    else:
        Dp = _round_up(D, td)

    # v7x has 2 TensorCores: ensure >= 2 parallel blocks when splittable without
    # meaningfully increasing padding.
    if (Bp // tb) * (Op // to) < 2:
        if auto_to and O > 128:
            to, Op = _balanced_tile(O, 512, 128, min_blocks=2)
        elif auto_tb and B > sub_align:
            tb, Bp = _balanced_tile(B, 512, sub_align, min_blocks=2)

    # Exact f32 norm math, computed once in the wrapper (XLA-fused, O(B*D)+O(O*D)).
    xf = x.astype(jnp.float32)
    wf = weight.astype(jnp.float32)
    inv_x = 10.0 / (jnp.sqrt(jnp.sum(xf * xf, axis=1, keepdims=True)) + 1e-5)      # (B, 1)
    inv_w = (1.0 / (jnp.sqrt(jnp.sum(wf * wf, axis=1, keepdims=True)) + 1e-5)).T   # (1, O)

    # Zero padding: padded rows/cols contribute zero partial sums; their scale
    # factors are padded with zeros so discarded outputs are exactly 0 (finite).
    xp = jnp.pad(x.astype(compute_dtype), ((0, Bp - B), (0, Dp - D)))
    wp = jnp.pad(weight.astype(compute_dtype), ((0, Op - O), (0, Dp - D)))
    inv_x_p = jnp.pad(inv_x, ((0, Bp - B), (0, 0)))
    inv_w_p = jnp.pad(inv_w, ((0, 0), (0, Op - O)))

    grid = (Bp // tb, Op // to, Dp // td)

    out = pl.pallas_call(
        _distlinear_kernel,
        out_shape=jax.ShapeDtypeStruct((Bp, Op), jnp.float32),
        grid_spec=pltpu.PrefetchScalarGridSpec(
            num_scalar_prefetch=0,
            grid=grid,
            in_specs=[
                pl.BlockSpec((tb, td), lambda i, j, k: (i, k)),   # x tile
                pl.BlockSpec((to, td), lambda i, j, k: (j, k)),   # W tile
                pl.BlockSpec((tb, 1), lambda i, j, k: (i, 0)),    # 10/(||x||+eps)
                pl.BlockSpec((1, to), lambda i, j, k: (0, j)),    # 1/(||w||+eps)
            ],
            out_specs=pl.BlockSpec((tb, to), lambda i, j, k: (i, j)),
        ),
        compiler_params=pltpu.CompilerParams(
            dimension_semantics=("parallel", "parallel", "arbitrary"),
            vmem_limit_bytes=_pick_vmem_limit(),
        ),
    )(xp, wp, inv_x_p, inv_w_p)

    return out[:B, :O]


def _reference(x, weight):
    x_n = x / (jnp.linalg.norm(x, axis=1, keepdims=True) + 1e-5)
    w_n = weight / (jnp.linalg.norm(weight, axis=1, keepdims=True) + 1e-5)
    return 10.0 * (x_n @ w_n.T)


if __name__ == "__main__":
    key = jax.random.PRNGKey(0)
    k1, k2, k3, k4 = jax.random.split(key, 4)

    # Small shapes consistent with the module: nn.Linear(indim=32, outdim=16), batch=8.
    B, indim, outdim = 8, 32, 16
    x = jax.random.normal(k1, (B, indim), dtype=jnp.float32)
    bound = 1.0 / (indim ** 0.5)
    W = jax.random.uniform(k2, (outdim, indim), dtype=jnp.float32,
                           minval=-bound, maxval=bound)

    ref = _reference(x, W)

    # Exact-f32 path: bit-faithful to the module's f32 semantics.
    scores_f32 = dist_linear(x, W, compute_dtype=jnp.float32)
    jax.block_until_ready(scores_f32)
    assert scores_f32.shape == (B, outdim)
    assert jnp.allclose(scores_f32, ref, atol=1e-5, rtol=1e-5), "f32-path mismatch"

    # Default bf16-MXU path (f32 accumulation, exact f32 norms).
    scores = dist_linear(x, W)
    jax.block_until_ready(scores)
    assert scores.shape == (B, outdim)
    assert jnp.allclose(scores, ref, atol=2e-2, rtol=2e-2), "small-shape mismatch"

    # Larger shape exercising the tiled grid: multi-step D reduction, multiple
    # output tiles (megacore split heuristic), and padding on every axis.
    B2, D2, O2 = 48, 2176, 200
    x2 = jax.random.normal(k3, (B2, D2), dtype=jnp.float32)
    W2 = jax.random.normal(k4, (O2, D2), dtype=jnp.float32) * (1.0 / (D2 ** 0.5))
    scores2 = dist_linear(x2, W2)
    jax.block_until_ready(scores2)
    assert scores2.shape == (B2, O2)
    assert jnp.allclose(scores2, _reference(x2, W2), atol=2e-2, rtol=2e-2), "tiled-shape mismatch"

    print("KERNEL_OK")
</pallas_src>

<mosaic_0001>
module attributes {stable_mosaic.version = 11 : i64} {
  func.func @_distlinear_kernel(%arg0: i32, %arg1: i32, %arg2: i32, %arg3: memref<8x128xf32, #tpu.memory_space<vmem>>, %arg4: memref<128x128xf32, #tpu.memory_space<vmem>>, %arg5: memref<8x1xf32, #tpu.memory_space<vmem>>, %arg6: memref<1x128xf32, #tpu.memory_space<vmem>>, %arg7: memref<8x128xf32, #tpu.memory_space<vmem>>) attributes {dimension_semantics = [#tpu.dimension_semantics<parallel>, #tpu.dimension_semantics<parallel>, #tpu.dimension_semantics<arbitrary>], iteration_bounds = array<i64: 1, 1, 1>, scalar_prefetch = 0 : i64, scratch_operands = 0 : i64, tpu.core_type = #tpu.core_type<tc>, window_params = [{transform_indices = @transform_0, window_bounds = array<i64: 8, 128>}, {transform_indices = @transform_1, window_bounds = array<i64: 128, 128>}, {transform_indices = @transform_2, window_bounds = array<i64: 8, 1>}, {transform_indices = @transform_3, window_bounds = array<i64: 1, 128>}, {transform_indices = @transform_4, window_bounds = array<i64: 8, 128>}]} {
    %c0 = arith.constant 0 : index
    %c0_0 = arith.constant 0 : index
    %0 = vector.load %arg3[%c0, %c0_0] : memref<8x128xf32, #tpu.memory_space<vmem>>, vector<8x128xf32>
    %c0_1 = arith.constant 0 : index
    %c0_2 = arith.constant 0 : index
    %1 = vector.load %arg4[%c0_1, %c0_2] : memref<128x128xf32, #tpu.memory_space<vmem>>, vector<128x128xf32>
    %cst = arith.constant dense<0.000000e+00> : vector<8x128xf32>
    %2 = tpu.matmul %0, %1, %cst {dimension_numbers = #tpu.dot_dimension_numbers<[1], [1], [0], [0], [0, 0, 1, 0], [], []>} : vector<8x128xf32>, vector<128x128xf32>, vector<8x128xf32> -> vector<8x128xf32>
    %c0_i32 = arith.constant 0 : i32
    %3 = arith.cmpi eq, %arg2, %c0_i32 : i32
    %4 = arith.extui %3 : i1 to i32
    %c0_i32_3 = arith.constant 0 : i32
    %5 = arith.cmpi ne, %4, %c0_i32_3 : i32
    scf.if %5 {
      %c0_8 = arith.constant 0 : index
      %c0_9 = arith.constant 0 : index
      %12 = vector.load %arg7[%c0_8, %c0_9] : memref<8x128xf32, #tpu.memory_space<vmem>>, vector<8x128xf32>
      tpu.vector_store %arg7[%c0_8, %c0_9], %2 {strides = array<i32>} : memref<8x128xf32, #tpu.memory_space<vmem>>, vector<8x128xf32>,
    } else {
    }
    %c0_i32_4 = arith.constant 0 : i32
    %6 = arith.cmpi ne, %arg2, %c0_i32_4 : i32
    %7 = arith.extui %6 : i1 to i32
    %c0_i32_5 = arith.constant 0 : i32
    %8 = arith.cmpi ne, %7, %c0_i32_5 : i32
    scf.if %8 {
      %c0_8 = arith.constant 0 : index
      %c0_9 = arith.constant 0 : index
      %12 = vector.load %arg7[%c0_8, %c0_9] : memref<8x128xf32, #tpu.memory_space<vmem>>, vector<8x128xf32>
      %13 = arith.addf %12, %2 : vector<8x128xf32>
      %c0_10 = arith.constant 0 : index
      %c0_11 = arith.constant 0 : index
      %14 = vector.load %arg7[%c0_10, %c0_11] : memref<8x128xf32, #tpu.memory_space<vmem>>, vector<8x128xf32>
      tpu.vector_store %arg7[%c0_10, %c0_11], %13 {strides = array<i32>} : memref<8x128xf32, #tpu.memory_space<vmem>>, vector<8x128xf32>,
    } else {
    }
    %c0_i32_6 = arith.constant 0 : i32
    %9 = arith.cmpi eq, %arg2, %c0_i32_6 : i32
    %10 = arith.extui %9 : i1 to i32
    %c0_i32_7 = arith.constant 0 : i32
    %11 = arith.cmpi ne, %10, %c0_i32_7 : i32
    scf.if %11 {
      %c0_8 = arith.constant 0 : index
      %c0_9 = arith.constant 0 : index
      %12 = vector.load %arg7[%c0_8, %c0_9] : memref<8x128xf32, #tpu.memory_space<vmem>>, vector<8x128xf32>
      %c0_10 = arith.constant 0 : index
      %c0_11 = arith.constant 0 : index
      %13 = vector.load %arg5[%c0_10, %c0_11] : memref<8x1xf32, #tpu.memory_space<vmem>>, vector<8x1xf32>
      %c0_12 = arith.constant 0 : index
      %c0_13 = arith.constant 0 : index
      %14 = vector.load %arg6[%c0_12, %c0_13] : memref<1x128xf32, #tpu.memory_space<vmem>>, vector<1x128xf32>
      %15 = vector.broadcast %13 : vector<8x1xf32> to vector<8x128xf32>
      %16 = vector.broadcast %14 : vector<1x128xf32> to vector<8x128xf32>
      %17 = arith.mulf %15, %16 : vector<8x128xf32>
      %18 = arith.mulf %12, %17 : vector<8x128xf32>
      %c0_14 = arith.constant 0 : index
      %c0_15 = arith.constant 0 : index
      %19 = vector.load %arg7[%c0_14, %c0_15] : memref<8x128xf32, #tpu.memory_space<vmem>>, vector<8x128xf32>
      tpu.vector_store %arg7[%c0_14, %c0_15], %18 {strides = array<i32>} : memref<8x128xf32, #tpu.memory_space<vmem>>, vector<8x128xf32>,
    } else {
    }
    return
  }
  func.func @transform_0(%arg0: i32, %arg1: i32, %arg2: i32) -> (i32, i32) {
    %c0_i32 = arith.constant 0 : i32
    return %arg0, %arg2 : i32, i32
  }
  func.func @transform_1(%arg0: i32, %arg1: i32, %arg2: i32) -> (i32, i32) {
    %c0_i32 = arith.constant 0 : i32
    return %arg1, %arg2 : i32, i32
  }
  func.func @transform_2(%arg0: i32, %arg1: i32, %arg2: i32) -> (i32, i32) {
    %c0_i32 = arith.constant 0 : i32
    %c0_i32_0 = arith.constant 0 : i32
    return %arg0, %c0_i32 : i32, i32
  }
  func.func @transform_3(%arg0: i32, %arg1: i32, %arg2: i32) -> (i32, i32) {
    %c0_i32 = arith.constant 0 : i32
    %c0_i32_0 = arith.constant 0 : i32
    return %c0_i32, %arg1 : i32, i32
  }
  func.func @transform_4(%arg0: i32, %arg1: i32, %arg2: i32) -> (i32, i32) {
    %c0_i32 = arith.constant 0 : i32
    return %arg0, %arg1 : i32, i32
  }
}

</mosaic_0001>

<bundles_post_ra>
// kernel: tpu_custom_call.1
= control target key start
LH: loop header
LB: loop body
LE: loop exit
PB: predicated region body
PF: predicated region fallthrough
CT: control target
= control target key end

     0   :  { %9 = vsyncpa [#allocation3], 0  ;;  %s366_s0 = inlined_call_operand.vmem [shape: f32[8,128], index: 0, kind: input, shape index: {}]   ;;  %s367_s1 = inlined_call_operand.hbm [shape: f32[128,128], index: 1, kind: input, shape index: {}]   ;;  %s368_s2 = inlined_call_operand.vmem [shape: f32[8,1], index: 2, kind: input, shape index: {}]   ;;  %s369_s3 = inlined_call_operand.vmem [shape: f32[1,128], index: 3, kind: input, shape index: {}]   ;;  %s370_s4 = inlined_call_operand.hbm [shape: f32[8,128], index: 4, kind: output, shape index: {}]  }
   0x1   :  { %10 = vsyncpa [#allocation4], 0  ;;  %s300_s15 = smov [#allocation2]   ;;  %s252_s19 = scalar_lea.hbm %s367_s1, 2048 }
   0x2   :  { %s18_s16 = sshll.u32 %s300_s15, 4  ;;  %p253_p0 = scmp.ne.s32.totalorder %s367_s1, %s252_s19  ;;  %s19_s16 = int_to_ptr.vmem [resolvable:$true] %s18_s16 }
   0x3   :  { %p256_p1 = scmp.lt.u32.totalorder %s252_s19, %s367_s1 }
   0x5   :  { %p258_p2 = pnand %p256_p1, %p253_p0 }
   0x7   :  { %261 = shalt.err (!%p258_p2)
}
   0x8   :  { %s262_s24 = scalar_lea.vmem %s19_s16, 2048  ;;  %p267_p4 = scmp.lt.s32.totalorder %s19_s16, %s19_s16 }
   0x9   :  { %p263_p3 = scmp.ne.s32.totalorder %s19_s16, %s262_s24  ;;  %p268_p5 = scmp.lt.s32.totalorder %s262_s24, %s262_s24 }
   0xb   :  { %p269_p6 = por %p268_p5, %p267_p4 }
   0xd   :  { %p270_p7 = pnand %p269_p6, %p263_p3 }
   0xf   :  { %273 = shalt.err (!%p270_p7)
}
  0x10   :  { %s301_s25 = smov 128   ;;  %s302_s26 = smov 8  }
  0x11   :  { %24 = dma.hbm_to_vmem [thread:$0]  %s367_s1, 2048, %s19_s16, [#allocation3], %s301_s25, %s301_s25, %s302_s26  }
  0x12   :  { %296 = dma.done.wait [#allocation3], 2048  }
  0x13   :  { %297 = vsyncadd [#allocation3], 4294965248  ;;  %v303_v0 = vmov 0.0|0.0   ;;  %vm304_vm0 = vmmov 0   ;;  %v305_v1 = vmov 0.0   ;;  %v306_v2 = vmov 0  }
  0x14   :  { %219 = vmatprep.subr.bf16.mxu0 %v303_v0  ;;  %216 = vmatprep.mubr.msk.f32.mxu0 %vm304_vm0, %v305_v1  ;;  %v33_v3 = vld [vmem:[#allocation2] sm:$0xff]  ;;  %v34_v4 = vld [vmem:[#allocation2 + $0x8] sm:$0xff]  ;;  %v35_v6 = vld [vmem:[#allocation2 + $0x10] sm:$0xff]  ;;  %s307_s7 = smov [#allocation5]  }
  0x15   :  { %251 = vset.pattern.permute.xlu0 %v306_v2  ;;  %v220_v5 = vpack.c.bf16 %v34_v4, %v33_v3  ;;  %v36_v7 = vld [vmem:[#allocation2 + $0x18] sm:$0xff]  ;;  %v135_v8 = vld [vmem:[%s368_s2] sm:$0xff]  ;;  %v38_v11 = vld [vmem:[#allocation2 + $0x28] sm:$0xff]  ;;  %s157_s8 = sshll.u32 %s307_s7, 4  ;;  %s158_s8 = int_to_ptr.vmem [resolvable:$true] %s157_s8 }
  0x16   :  { %139 = vperm.xlu0 %251, %v135_v8   ;;  %v223_v9 = vpack.c.bf16 %v36_v7, %v35_v6  ;;  %v37_v10 = vld [vmem:[#allocation2 + $0x20] sm:$0xff]  ;;  %v39_v13 = vld [vmem:[#allocation2 + $0x30] sm:$0xff]  ;;  %v40_v14 = vld [vmem:[#allocation2 + $0x38] sm:$0xff]  ;;  %s274_s9 = scalar_lea.vmem %s158_s8, 128  ;;  %p279_p9 = scmp.lt.s32.totalorder %s158_s8, %s158_s8 }
  0x17   :  { %221 = vmatpush3.bf16.xpose.msra.mxu0 %v220_v5  ;;  %v226_v12 = vpack.c.bf16 %v38_v11, %v37_v10  ;;  %v229_v15 = vpack.c.bf16 %v40_v14, %v39_v13  ;;  %v41_v16 = vld [vmem:[#allocation2 + $0x40] sm:$0xff]  ;;  %v42_v17 = vld [vmem:[#allocation2 + $0x48] sm:$0xff]  ;;  %v43_v19 = vld [vmem:[#allocation2 + $0x50] sm:$0xff]  ;;  %p275_p8 = scmp.ne.s32.totalorder %s158_s8, %s274_s9  ;;  %p280_p10 = scmp.lt.s32.totalorder %s274_s9, %s274_s9 }
  0x18   :  { %222 = vmatprep.subr.bf16.mxu0 %v303_v0  ;;  %v232_v18 = vpack.c.bf16 %v42_v17, %v41_v16  ;;  %v44_v20 = vld [vmem:[#allocation2 + $0x58] sm:$0xff]  ;;  %v45_v22 = vld [vmem:[#allocation2 + $0x60] sm:$0xff]  ;;  %v46_v23 = vld [vmem:[#allocation2 + $0x68] sm:$0xff] }
  0x19   :  { %v235_v21 = vpack.c.bf16 %v44_v20, %v43_v19  ;;  %v238_v24 = vpack.c.bf16 %v46_v23, %v45_v22  ;;  %v47_v25 = vld [vmem:[#allocation2 + $0x70] sm:$0xff]  ;;  %v48_v26 = vld [vmem:[#allocation2 + $0x78] sm:$0xff]  ;;  %v32_v28 = vld [vmem:[%s366_s0] sm:$0xff]  ;;  %p281_p11 = por %p280_p10, %p279_p9 }
  0x1a   :  { %v241_v27 = vpack.c.bf16 %v48_v26, %v47_v25  ;;  %v166_v29 = vld [vmem:[%s369_s3] ss:$0 sm:$0xff] }
  0x1b   :  { %p282_p12 = pnand %p281_p11, %p275_p8 }
  0x1f   :  { %224 = vmatpush3.bf16.xpose.msra.mxu0 %v223_v9 }
  0x20   :  { %225 = vmatprep.subr.bf16.mxu0 %v303_v0 }
  0x27   :  { %227 = vmatpush3.bf16.xpose.msra.mxu0 %v226_v12 }
  0x28   :  { %228 = vmatprep.subr.bf16.mxu0 %v303_v0 }
  0x2f   :  { %230 = vmatpush3.bf16.xpose.msra.mxu0 %v229_v15 }
  0x30   :  { %231 = vmatprep.subr.bf16.mxu0 %v303_v0 }
  0x37   :  { %233 = vmatpush3.bf16.xpose.msra.mxu0 %v232_v18 }
  0x38   :  { %234 = vmatprep.subr.bf16.mxu0 %v303_v0 }
  0x3f   :  { %236 = vmatpush3.bf16.xpose.msra.mxu0 %v235_v21 }
  0x40   :  { %237 = vmatprep.subr.bf16.mxu0 %v303_v0 }
  0x47   :  { %239 = vmatpush3.bf16.xpose.msra.mxu0 %v238_v24 }
  0x48   :  { %240 = vmatprep.subr.bf16.mxu0 %v303_v0 }
  0x4f   :  { %242 = vmatpush3.bf16.xpose.msra.mxu0 %v241_v27 }
  0x56   :  { %217 = vmatmul.mubr.f32.vlgmr.msra.gmra.mrb[0].mxu0 %v32_v28 }
  0x95   :  { %v140_v30 = vpop.permute.xlu0 %139 }
  0x96   :  { %v148_v31 = vmul.f32 %v166_v29, %v140_v30 }
 0x129   :  { %v115_v32 = vpop.f32.mrb[0].mxu0 }
 0x12a   :  { %v218_v33 = vpop.f32.mrb[1].mxu0  ;;  %v149_v34 = vmul.f32 %v148_v31, %v115_v32 }
 0x12c   :  { %150 = vst [vmem:[#allocation5] sm:$0xff] %v149_v34 }
 0x12d   :  { %285 = shalt.err (!%p282_p12)
}
 0x12e   :  { %s286_s3 = scalar_lea.hbm %s370_s4, 128 }
 0x12f   :  { %p287_p13 = scmp.ne.s32.totalorder %s370_s4, %s286_s3  ;;  %p290_p0 = scmp.lt.u32.totalorder %s286_s3, %s370_s4 }
 0x131   :  { %p292_p1 = pnand %p290_p0, %p287_p13 }
 0x133   :  { %295 = shalt.err (!%p292_p1)
}
 0x134   :  { %160 = dma.vmem_to_hbm [thread:$0]  %s158_s8, 128, %s370_s4, [#allocation4]  }
 0x135   :  { %298 = dma.done.wait [#allocation4], 128  }
 0x136   :  { %299 = vsyncadd [#allocation4], 4294967168 }
 0x137   :  { %164 = vsyncpa [#allocation3], 1 }
 0x138   :  { %165 = vsyncpa [#allocation4], 1 }

</bundles_post_ra>
